<compile_context>
chip_gen: v5e
topology: v5e:2x2
jax: 0.10.0
libtpu: 0.0.40
codegen_flags: <defaults>
</compile_context>

<pallas_src>
import jax
import jax.numpy as jnp
from jax import lax
from jax.experimental import pallas as pl
from jax.experimental.pallas import tpu as pltpu


def _pick_tile_n(n, m):
    """Largest N-tile that divides N, is a multiple of 128 (or == N), and keeps
    the (M, TILE_N) f32 distance slab around <= 4 MiB."""
    budget_lanes = (4 * 1024 * 1024) // (4 * max(int(m), 1))
    cap = max(128, min(1024, (budget_lanes // 128) * 128))
    if n <= cap:
        return n
    for t in range(cap, 127, -128):
        if n % t == 0:
            return t
    return n  # no 128-multiple divisor: fall back to a single full tile


def _make_loss_kernel(num_kp: int, knn_k: int, knn_flat: int,
                      margin: float, n_tiles: int):
    c = float(margin)
    inv_k = 1.0 / float(knn_k)
    K = int(num_kp)
    KK = int(knn_flat)
    f32 = jnp.float32

    def huber(x):
        return jnp.where(x < c, 0.5 * x * x, c * x - 0.5 * c * c)

    def kernel(small_ref, tgt_ref, src_ref,       # inputs
               nc_ref, gal_ref,                   # outputs (per batch)
               min_m_scr, hub_n_scr):             # scratch
        nt = pl.program_id(1)

        # ---- per-batch init of the running accumulators ----
        @pl.when(nt == 0)
        def _():
            min_m_scr[...] = jnp.full_like(min_m_scr, jnp.inf)
            hub_n_scr[...] = jnp.zeros_like(hub_n_scr)

        # ---- robust chamfer, one (M, TILE_N) slab per grid step ----
        tgt = tgt_ref[0].astype(f32)                # (3, M)   lane-dense, resident
        src = src_ref[0].astype(f32)                # (3, TILE_N) streamed tile

        ry = jnp.sum(src * src, axis=0, keepdims=True)          # (1, TILE_N)
        src_m2 = -2.0 * src                                      # fold -2 into the 3xTILE_N operand
        # cross term on the MXU, contracting the channel axis (no transpose of tgt)
        zz = lax.dot_general(tgt, src_m2, (((0,), (0,)), ((), ())),
                             preferred_element_type=f32)         # (M, TILE_N)
        # |tgt|^2 as a (M, 1) column via a tiny ones-matmul (MXU; no XLU transpose)
        rx_col = lax.dot_general(tgt * tgt, jnp.ones((3, 1), f32),
                                 (((0,), (0,)), ((), ())),
                                 preferred_element_type=f32)     # (M, 1)
        P = jnp.maximum(zz + ry + rx_col, 0.0)                   # squared distances

        # per-source-point min over all M is complete within this tile:
        # apply huber and accumulate per lane (reduced to a scalar only at the end)
        hub_n_scr[...] += huber(jnp.min(P, axis=0, keepdims=True))
        # per-target-point running min over the streamed N-tiles
        min_m_scr[...] = jnp.minimum(min_m_scr[...],
                                     jnp.min(P, axis=1, keepdims=True))

        # ---- finalize once per batch element ----
        @pl.when(nt == n_tiles - 1)
        def _():
            gal = jnp.sum(hub_n_scr[...]) + jnp.sum(huber(min_m_scr[...]))
            gal_ref[...] = jnp.full((1, 1, 1), gal, f32)

            # neighborhood consensus loss (tiny, block resident across tiles)
            small = small_ref[0].astype(f32)         # (3, 4 + 2K + 2KK)
            R = small[:, 0:3]
            t = small[:, 3:4]
            src_kp = small[:, 4:4 + K]
            tgt_kp = small[:, 4 + K:4 + 2 * K]
            src_knn = small[:, 4 + 2 * K:4 + 2 * K + KK]
            tgt_knn = small[:, 4 + 2 * K + KK:4 + 2 * K + 2 * KK]

            transformed = jnp.dot(R, src_kp, preferred_element_type=f32) + t
            kp_diff = transformed - tgt_kp
            knn_diff = src_knn - tgt_knn
            nc = jnp.sum(knn_diff * knn_diff) * inv_k + jnp.sum(kp_diff * kp_diff)
            nc_ref[...] = jnp.full((1, 1, 1), nc, f32)

    return kernel


def loss_function(src_keypoints, tgt_keypoints, rotation_ab, translation_ab,
                  src_keypoints_knn, tgt_keypoints_knn, k, src_transformed, tgt,
                  loss_margin):
    """Returns (neighborhood_consensus_loss, global_alignment_loss) as scalars."""
    B, _, K = src_keypoints.shape
    kk = src_keypoints_knn.shape[-1]
    N = src_transformed.shape[-1]
    M = tgt.shape[-1]
    KK = K * kk

    f32 = jnp.float32
    # Concatenate the six tiny per-batch tensors into ONE lane-dense (B, 3, L)
    # input -> one small DMA per batch instead of six.
    small = jnp.concatenate([
        rotation_ab.astype(f32),                           # (B, 3, 3)
        translation_ab.reshape(B, 3, 1).astype(f32),       # (B, 3, 1)
        src_keypoints.astype(f32),                         # (B, 3, K)
        tgt_keypoints.astype(f32),                         # (B, 3, K)
        src_keypoints_knn.reshape(B, 3, KK).astype(f32),   # (B, 3, K*kk)
        tgt_keypoints_knn.reshape(B, 3, KK).astype(f32),   # (B, 3, K*kk)
    ], axis=2)
    L = small.shape[-1]

    # Large clouds stay channel-first / lane-dense and keep their input dtype;
    # the kernel casts to f32 after the DMA.
    tile_n = _pick_tile_n(N, M)
    n_tiles = N // tile_n

    kernel = _make_loss_kernel(K, int(k), KK, float(loss_margin), n_tiles)

    nc_out, gal_out = pl.pallas_call(
        kernel,
        out_shape=(jax.ShapeDtypeStruct((B, 1, 1), f32),
                   jax.ShapeDtypeStruct((B, 1, 1), f32)),
        grid_spec=pltpu.PrefetchScalarGridSpec(
            num_scalar_prefetch=0,
            grid=(B, n_tiles),
            in_specs=[
                pl.BlockSpec((1, 3, L), lambda b, n: (b, 0, 0)),       # tiny pose/kp pack
                pl.BlockSpec((1, 3, M), lambda b, n: (b, 0, 0)),       # tgt, lane-dense, resident
                pl.BlockSpec((1, 3, tile_n), lambda b, n: (b, 0, n)),  # src_transformed N-tiles
            ],
            out_specs=(pl.BlockSpec((1, 1, 1), lambda b, n: (b, 0, 0)),
                       pl.BlockSpec((1, 1, 1), lambda b, n: (b, 0, 0))),
            scratch_shapes=[pltpu.VMEM((M, 1), f32),        # running min over N per tgt point
                            pltpu.VMEM((1, tile_n), f32)],  # per-lane huber accumulator
        ),
        compiler_params=pltpu.CompilerParams(
            dimension_semantics=("parallel", "arbitrary"),
            vmem_limit_bytes=48 * 1024 * 1024),
    )(small, tgt, src_transformed)

    return jnp.sum(nc_out), jnp.sum(gal_out)


def _reference(src_kp, tgt_kp, rot, trans, src_knn, tgt_knn, k, src_tf, tgt, margin):
    # pure-JAX reference mirroring the PyTorch forward
    transformed = jnp.einsum('bij,bjk->bik', rot, src_kp) + trans[:, :, None]
    kp_loss = jnp.sum((transformed - tgt_kp) ** 2)
    knn_loss = jnp.sum((src_knn - tgt_knn) ** 2)
    nc = knn_loss / k + kp_loss

    preds = jnp.transpose(src_tf, (0, 2, 1))   # (B, N, 3)
    gts = jnp.transpose(tgt, (0, 2, 1))        # (B, M, 3)
    P = jnp.sum((gts[:, :, None, :] - preds[:, None, :, :]) ** 2, axis=-1)  # (B, M, N)

    def huber(x):
        return jnp.where(x < margin, 0.5 * x * x, margin * x - 0.5 * margin * margin)

    gal = jnp.sum(huber(jnp.min(P, axis=1))) + jnp.sum(huber(jnp.min(P, axis=2)))
    return nc, gal


if __name__ == "__main__":
    key = jax.random.PRNGKey(0)
    B, K, knn_k, N, M = 2, 8, 4, 16, 16
    margin = 0.5

    keys = jax.random.split(key, 8)
    src_keypoints = jax.random.normal(keys[0], (B, 3, K), dtype=jnp.float32)
    tgt_keypoints = jax.random.normal(keys[1], (B, 3, K), dtype=jnp.float32)
    rotation_ab = jax.random.normal(keys[2], (B, 3, 3), dtype=jnp.float32)
    translation_ab = jax.random.normal(keys[3], (B, 3), dtype=jnp.float32)
    src_keypoints_knn = jax.random.normal(keys[4], (B, 3, K, knn_k), dtype=jnp.float32)
    tgt_keypoints_knn = jax.random.normal(keys[5], (B, 3, K, knn_k), dtype=jnp.float32)
    src_transformed = jax.random.normal(keys[6], (B, 3, N), dtype=jnp.float32)
    tgt = jax.random.normal(keys[7], (B, 3, M), dtype=jnp.float32)

    nc_loss, gal_loss = loss_function(
        src_keypoints, tgt_keypoints, rotation_ab, translation_ab,
        src_keypoints_knn, tgt_keypoints_knn, knn_k, src_transformed, tgt,
        margin)
    jax.block_until_ready((nc_loss, gal_loss))

    nc_ref, gal_ref = _reference(
        src_keypoints, tgt_keypoints, rotation_ab, translation_ab,
        src_keypoints_knn, tgt_keypoints_knn, knn_k, src_transformed, tgt,
        margin)

    assert jnp.allclose(nc_loss, nc_ref, rtol=1e-4, atol=1e-4), (nc_loss, nc_ref)
    assert jnp.allclose(gal_loss, gal_ref, rtol=1e-4, atol=1e-4), (gal_loss, gal_ref)

    print("KERNEL_OK")
</pallas_src>

<mosaic_0001>
module attributes {stable_mosaic.version = 11 : i64} {
  func.func @kernel(%arg0: i32, %arg1: i32, %arg2: memref<1x3x84xf32, #tpu.memory_space<vmem>>, %arg3: memref<1x3x16xf32, #tpu.memory_space<vmem>>, %arg4: memref<1x3x16xf32, #tpu.memory_space<vmem>>, %arg5: memref<1x1x1xf32, #tpu.memory_space<vmem>>, %arg6: memref<1x1x1xf32, #tpu.memory_space<vmem>>, %arg7: memref<16x1xf32, #tpu.memory_space<vmem>>, %arg8: memref<1x16xf32, #tpu.memory_space<vmem>>) attributes {dimension_semantics = [#tpu.dimension_semantics<parallel>, #tpu.dimension_semantics<arbitrary>], iteration_bounds = array<i64: 2, 1>, scalar_prefetch = 0 : i64, scratch_operands = 2 : i64, tpu.core_type = #tpu.core_type<tc>, window_params = [{transform_indices = @transform_0, window_bounds = array<i64: 1, 3, 84>}, {transform_indices = @transform_1, window_bounds = array<i64: 1, 3, 16>}, {transform_indices = @transform_2, window_bounds = array<i64: 1, 3, 16>}, {transform_indices = @transform_3, window_bounds = array<i64: 1, 1, 1>}, {transform_indices = @transform_4, window_bounds = array<i64: 1, 1, 1>}]} {
    %c0_i32 = arith.constant 0 : i32
    %0 = arith.cmpi eq, %arg1, %c0_i32 : i32
    %1 = arith.extui %0 : i1 to i32
    %c0_i32_0 = arith.constant 0 : i32
    %2 = arith.cmpi ne, %1, %c0_i32_0 : i32
    scf.if %2 {
      %cst_27 = arith.constant 0x7F800000 : f32
      %45 = vector.broadcast %cst_27 : f32 to vector<16x1xf32>
      %c0_28 = arith.constant 0 : index
      %c0_29 = arith.constant 0 : index
      %46 = vector.load %arg7[%c0_28, %c0_29] : memref<16x1xf32, #tpu.memory_space<vmem>>, vector<16x1xf32>
      tpu.vector_store %arg7[%c0_28, %c0_29], %45 {strides = array<i32>} : memref<16x1xf32, #tpu.memory_space<vmem>>, vector<16x1xf32>,
      %cst_30 = arith.constant 0.000000e+00 : f32
      %47 = vector.broadcast %cst_30 : f32 to vector<1x16xf32>
      %c0_31 = arith.constant 0 : index
      %c0_32 = arith.constant 0 : index
      %48 = vector.load %arg8[%c0_31, %c0_32] : memref<1x16xf32, #tpu.memory_space<vmem>>, vector<1x16xf32>
      tpu.vector_store %arg8[%c0_31, %c0_32], %47 {strides = array<i32>} : memref<1x16xf32, #tpu.memory_space<vmem>>, vector<1x16xf32>,
    } else {
    }
    %c0 = arith.constant 0 : index
    %c0_1 = arith.constant 0 : index
    %c0_2 = arith.constant 0 : index
    %3 = vector.load %arg3[%c0, %c0_1, %c0_2] : memref<1x3x16xf32, #tpu.memory_space<vmem>>, vector<1x3x16xf32>
    %4 = vector.shape_cast %3 : vector<1x3x16xf32> to vector<3x16xf32>
    %c0_3 = arith.constant 0 : index
    %c0_4 = arith.constant 0 : index
    %c0_5 = arith.constant 0 : index
    %5 = vector.load %arg4[%c0_3, %c0_4, %c0_5] : memref<1x3x16xf32, #tpu.memory_space<vmem>>, vector<1x3x16xf32>
    %6 = vector.shape_cast %5 : vector<1x3x16xf32> to vector<3x16xf32>
    %7 = arith.mulf %6, %6 : vector<3x16xf32>
    %cst = arith.constant dense<0.000000e+00> : vector<16xf32>
    %8 = vector.multi_reduction <add>, %7, %cst [0] : vector<3x16xf32> to vector<16xf32>
    %9 = vector.shape_cast %8 : vector<16xf32> to vector<1x16xf32>
    %cst_6 = arith.constant -2.000000e+00 : f32
    %10 = vector.broadcast %cst_6 : f32 to vector<3x16xf32>
    %11 = arith.mulf %10, %6 : vector<3x16xf32>
    %cst_7 = arith.constant dense<0.000000e+00> : vector<16x16xf32>
    %12 = tpu.matmul %4, %11, %cst_7 {dimension_numbers = #tpu.dot_dimension_numbers<[0], [0], [1], [1], [0, 1, 1, 1], [], []>} : vector<3x16xf32>, vector<3x16xf32>, vector<16x16xf32> -> vector<16x16xf32>
    %13 = arith.mulf %4, %4 : vector<3x16xf32>
    %cst_8 = arith.constant 1.000000e+00 : f32
    %14 = vector.broadcast %cst_8 : f32 to vector<3x1xf32>
    %cst_9 = arith.constant dense<0.000000e+00> : vector<16x1xf32>
    %15 = tpu.matmul %13, %14, %cst_9 {dimension_numbers = #tpu.dot_dimension_numbers<[0], [0], [1], [1], [0, 1, 1, 1], [], []>} : vector<3x16xf32>, vector<3x1xf32>, vector<16x1xf32> -> vector<16x1xf32>
    %16 = vector.broadcast %9 : vector<1x16xf32> to vector<16x16xf32>
    %17 = arith.addf %12, %16 : vector<16x16xf32>
    %18 = vector.broadcast %15 : vector<16x1xf32> to vector<16x16xf32>
    %19 = arith.addf %17, %18 : vector<16x16xf32>
    %cst_10 = arith.constant 0.000000e+00 : f32
    %20 = vector.broadcast %cst_10 : f32 to vector<16x16xf32>
    %21 = arith.maximumf %19, %20 : vector<16x16xf32>
    %c0_11 = arith.constant 0 : index
    %c0_12 = arith.constant 0 : index
    %22 = vector.load %arg8[%c0_11, %c0_12] : memref<1x16xf32, #tpu.memory_space<vmem>>, vector<1x16xf32>
    %cst_13 = arith.constant dense<0x7F800000> : vector<16xf32>
    %23 = vector.multi_reduction <minimumf>, %21, %cst_13 [0] : vector<16x16xf32> to vector<16xf32>
    %24 = vector.shape_cast %23 : vector<16xf32> to vector<1x16xf32>
    %cst_14 = arith.constant 5.000000e-01 : f32
    %25 = vector.broadcast %cst_14 : f32 to vector<1x16xf32>
    %26 = arith.cmpf olt, %24, %25 : vector<1x16xf32>
    %cst_15 = arith.constant 5.000000e-01 : f32
    %27 = vector.broadcast %cst_15 : f32 to vector<1x16xf32>
    %28 = arith.mulf %27, %24 : vector<1x16xf32>
    %29 = arith.mulf %28, %24 : vector<1x16xf32>
    %cst_16 = arith.constant 5.000000e-01 : f32
    %30 = vector.broadcast %cst_16 : f32 to vector<1x16xf32>
    %31 = arith.mulf %30, %24 : vector<1x16xf32>
    %cst_17 = arith.constant 1.250000e-01 : f32
    %32 = vector.broadcast %cst_17 : f32 to vector<1x16xf32>
    %33 = arith.subf %31, %32 : vector<1x16xf32>
    %34 = arith.select %26, %29, %33 : vector<1x16xi1>, vector<1x16xf32>
    %35 = arith.addf %22, %34 : vector<1x16xf32>
    %c0_18 = arith.constant 0 : index
    %c0_19 = arith.constant 0 : index
    %36 = vector.load %arg8[%c0_18, %c0_19] : memref<1x16xf32, #tpu.memory_space<vmem>>, vector<1x16xf32>
    tpu.vector_store %arg8[%c0_18, %c0_19], %35 {strides = array<i32>} : memref<1x16xf32, #tpu.memory_space<vmem>>, vector<1x16xf32>,
    %c0_20 = arith.constant 0 : index
    %c0_21 = arith.constant 0 : index
    %37 = vector.load %arg7[%c0_20, %c0_21] : memref<16x1xf32, #tpu.memory_space<vmem>>, vector<16x1xf32>
    %cst_22 = arith.constant dense<0x7F800000> : vector<16xf32>
    %38 = vector.multi_reduction <minimumf>, %21, %cst_22 [1] : vector<16x16xf32> to vector<16xf32>
    %39 = vector.shape_cast %38 : vector<16xf32> to vector<16x1xf32>
    %40 = arith.minimumf %37, %39 : vector<16x1xf32>
    %c0_23 = arith.constant 0 : index
    %c0_24 = arith.constant 0 : index
    %41 = vector.load %arg7[%c0_23, %c0_24] : memref<16x1xf32, #tpu.memory_space<vmem>>, vector<16x1xf32>
    tpu.vector_store %arg7[%c0_23, %c0_24], %40 {strides = array<i32>} : memref<16x1xf32, #tpu.memory_space<vmem>>, vector<16x1xf32>,
    %c0_i32_25 = arith.constant 0 : i32
    %42 = arith.cmpi eq, %arg1, %c0_i32_25 : i32
    %43 = arith.extui %42 : i1 to i32
    %c0_i32_26 = arith.constant 0 : i32
    %44 = arith.cmpi ne, %43, %c0_i32_26 : i32
    scf.if %44 {
      %c0_27 = arith.constant 0 : index
      %c0_28 = arith.constant 0 : index
      %45 = vector.load %arg8[%c0_27, %c0_28] : memref<1x16xf32, #tpu.memory_space<vmem>>, vector<1x16xf32>
      %46 = vector.shape_cast %45 : vector<1x16xf32> to vector<1x1x16xf32>
      %cst_29 = arith.constant dense<0.000000e+00> : vector<1xf32>
      %47 = vector.multi_reduction <add>, %46, %cst_29 [1, 2] : vector<1x1x16xf32> to vector<1xf32>
      %48 = vector.shape_cast %47 : vector<1xf32> to vector<1x1x1xf32>
      %49 = vector.extract %48[0, 0, 0] : f32 from vector<1x1x1xf32>
      %c0_30 = arith.constant 0 : index
      %c0_31 = arith.constant 0 : index
      %50 = vector.load %arg7[%c0_30, %c0_31] : memref<16x1xf32, #tpu.memory_space<vmem>>, vector<16x1xf32>
      %cst_32 = arith.constant 5.000000e-01 : f32
      %51 = vector.broadcast %cst_32 : f32 to vector<16x1xf32>
      %52 = arith.cmpf olt, %50, %51 : vector<16x1xf32>
      %cst_33 = arith.constant 5.000000e-01 : f32
      %53 = vector.broadcast %cst_33 : f32 to vector<16x1xf32>
      %54 = arith.mulf %53, %50 : vector<16x1xf32>
      %55 = arith.mulf %54, %50 : vector<16x1xf32>
      %cst_34 = arith.constant 5.000000e-01 : f32
      %56 = vector.broadcast %cst_34 : f32 to vector<16x1xf32>
      %57 = arith.mulf %56, %50 : vector<16x1xf32>
      %cst_35 = arith.constant 1.250000e-01 : f32
      %58 = vector.broadcast %cst_35 : f32 to vector<16x1xf32>
      %59 = arith.subf %57, %58 : vector<16x1xf32>
      %60 = arith.select %52, %55, %59 : vector<16x1xi1>, vector<16x1xf32>
      %61 = vector.shape_cast %60 : vector<16x1xf32> to vector<1x16x1xf32>
      %cst_36 = arith.constant dense<0.000000e+00> : vector<1xf32>
      %62 = vector.multi_reduction <add>, %61, %cst_36 [1, 2] : vector<1x16x1xf32> to vector<1xf32>
      %63 = vector.shape_cast %62 : vector<1xf32> to vector<1x1x1xf32>
      %64 = vector.extract %63[0, 0, 0] : f32 from vector<1x1x1xf32>
      %65 = arith.addf %49, %64 : f32
      %66 = vector.broadcast %65 : f32 to vector<1x1x1xf32>
      %c0_37 = arith.constant 0 : index
      %c0_38 = arith.constant 0 : index
      %c0_39 = arith.constant 0 : index
      %67 = vector.load %arg6[%c0_37, %c0_38, %c0_39] : memref<1x1x1xf32, #tpu.memory_space<vmem>>, vector<1x1x1xf32>
      tpu.vector_store %arg6[%c0_37, %c0_38, %c0_39], %66 {strides = array<i32>} : memref<1x1x1xf32, #tpu.memory_space<vmem>>, vector<1x1x1xf32>,
      %c0_40 = arith.constant 0 : index
      %c0_41 = arith.constant 0 : index
      %c0_42 = arith.constant 0 : index
      %68 = vector.load %arg2[%c0_40, %c0_41, %c0_42] : memref<1x3x84xf32, #tpu.memory_space<vmem>>, vector<1x3x84xf32>
      %69 = vector.shape_cast %68 : vector<1x3x84xf32> to vector<3x84xf32>
      %70 = vector.extract_strided_slice %69 {offsets = [0, 0], sizes = [3, 3], strides = [1, 1]} : vector<3x84xf32> to vector<3x3xf32>
      %71 = vector.extract_strided_slice %69 {offsets = [0, 3], sizes = [3, 1], strides = [1, 1]} : vector<3x84xf32> to vector<3x1xf32>
      %72 = vector.extract_strided_slice %69 {offsets = [0, 4], sizes = [3, 8], strides = [1, 1]} : vector<3x84xf32> to vector<3x8xf32>
      %73 = vector.extract_strided_slice %69 {offsets = [0, 12], sizes = [3, 8], strides = [1, 1]} : vector<3x84xf32> to vector<3x8xf32>
      %74 = vector.extract_strided_slice %69 {offsets = [0, 20], sizes = [3, 32], strides = [1, 1]} : vector<3x84xf32> to vector<3x32xf32>
      %75 = vector.extract_strided_slice %69 {offsets = [0, 52], sizes = [3, 32], strides = [1, 1]} : vector<3x84xf32> to vector<3x32xf32>
      %cst_43 = arith.constant dense<0.000000e+00> : vector<3x8xf32>
      %76 = tpu.matmul %70, %72, %cst_43 {dimension_numbers = #tpu.dot_dimension_numbers<[1], [0], [0], [1], [0, 0, 1, 1], [], []>} : vector<3x3xf32>, vector<3x8xf32>, vector<3x8xf32> -> vector<3x8xf32>
      %77 = vector.broadcast %71 : vector<3x1xf32> to vector<3x8xf32>
      %78 = arith.addf %76, %77 : vector<3x8xf32>
      %79 = arith.subf %78, %73 : vector<3x8xf32>
      %80 = arith.subf %74, %75 : vector<3x32xf32>
      %81 = arith.mulf %80, %80 : vector<3x32xf32>
      %82 = vector.shape_cast %81 : vector<3x32xf32> to vector<1x3x32xf32>
      %cst_44 = arith.constant dense<0.000000e+00> : vector<1xf32>
      %83 = vector.multi_reduction <add>, %82, %cst_44 [1, 2] : vector<1x3x32xf32> to vector<1xf32>
      %84 = vector.shape_cast %83 : vector<1xf32> to vector<1x1x1xf32>
      %85 = vector.extract %84[0, 0, 0] : f32 from vector<1x1x1xf32>
      %cst_45 = arith.constant 2.500000e-01 : f32
      %86 = arith.mulf %85, %cst_45 : f32
      %87 = arith.mulf %79, %79 : vector<3x8xf32>
      %88 = vector.shape_cast %87 : vector<3x8xf32> to vector<1x3x8xf32>
      %cst_46 = arith.constant dense<0.000000e+00> : vector<1xf32>
      %89 = vector.multi_reduction <add>, %88, %cst_46 [1, 2] : vector<1x3x8xf32> to vector<1xf32>
      %90 = vector.shape_cast %89 : vector<1xf32> to vector<1x1x1xf32>
      %91 = vector.extract %90[0, 0, 0] : f32 from vector<1x1x1xf32>
      %92 = arith.addf %86, %91 : f32
      %93 = vector.broadcast %92 : f32 to vector<1x1x1xf32>
      %c0_47 = arith.constant 0 : index
      %c0_48 = arith.constant 0 : index
      %c0_49 = arith.constant 0 : index
      %94 = vector.load %arg5[%c0_47, %c0_48, %c0_49] : memref<1x1x1xf32, #tpu.memory_space<vmem>>, vector<1x1x1xf32>
      tpu.vector_store %arg5[%c0_47, %c0_48, %c0_49], %93 {strides = array<i32>} : memref<1x1x1xf32, #tpu.memory_space<vmem>>, vector<1x1x1xf32>,
    } else {
    }
    return
  }
  func.func @transform_0(%arg0: i32, %arg1: i32) -> (i32, i32, i32) {
    %c0_i32 = arith.constant 0 : i32
    %c0_i32_0 = arith.constant 0 : i32
    %c0_i32_1 = arith.constant 0 : i32
    return %arg0, %c0_i32, %c0_i32_0 : i32, i32, i32
  }
  func.func @transform_1(%arg0: i32, %arg1: i32) -> (i32, i32, i32) {
    %c0_i32 = arith.constant 0 : i32
    %c0_i32_0 = arith.constant 0 : i32
    %c0_i32_1 = arith.constant 0 : i32
    return %arg0, %c0_i32, %c0_i32_0 : i32, i32, i32
  }
  func.func @transform_2(%arg0: i32, %arg1: i32) -> (i32, i32, i32) {
    %c0_i32 = arith.constant 0 : i32
    %c0_i32_0 = arith.constant 0 : i32
    return %arg0, %c0_i32, %arg1 : i32, i32, i32
  }
  func.func @transform_3(%arg0: i32, %arg1: i32) -> (i32, i32, i32) {
    %c0_i32 = arith.constant 0 : i32
    %c0_i32_0 = arith.constant 0 : i32
    %c0_i32_1 = arith.constant 0 : i32
    return %arg0, %c0_i32, %c0_i32_0 : i32, i32, i32
  }
  func.func @transform_4(%arg0: i32, %arg1: i32) -> (i32, i32, i32) {
    %c0_i32 = arith.constant 0 : i32
    %c0_i32_0 = arith.constant 0 : i32
    %c0_i32_1 = arith.constant 0 : i32
    return %arg0, %c0_i32, %c0_i32_0 : i32, i32, i32
  }
}

</mosaic_0001>

<bundles_post_ra>
// kernel: tpu_custom_call.1
= control target key start
LH: loop header
LB: loop body
LE: loop exit
PB: predicated region body
PF: predicated region fallthrough
CT: control target
= control target key end

     0   :  { %s798_s15 = smov 0   ;;  %s800_s16 = smov 0   ;;  %s871_s0 = inlined_call_operand.vmem [shape: f32[2,3,84], index: 0, kind: input, shape index: {}]   ;;  %s872_s1 = inlined_call_operand.vmem [shape: f32[2,3,16], index: 1, kind: input, shape index: {}]   ;;  %s873_s2 = inlined_call_operand.vmem [shape: f32[2,3,16], index: 2, kind: input, shape index: {}]   ;;  %s874_s3 = inlined_call_operand.vmem [shape: f32[2,1,1], index: 3, kind: output, shape index: {0}]   ;;  %s875_s4 = inlined_call_operand.vmem [shape: f32[2,1,1], index: 4, kind: output, shape index: {1}]  }
   0x1   :  { %s802_s17 = smov 0  }
   0x2 LB: > { %s27_s18 = sadd.s32 1, %s758_s16  ;;  %p678_p0 = scmp.ge.s32.totalorder %s762_s17, 1  ;;  %s762_s17 = sphi %s802_s17, %s15_s17   ;;  %s758_s16 = sphi %s800_s16, %s877_s16   ;;  %s754_s15 = sphi %s798_s15, %s876_s15  }
   0x3   : > { %p29_p1 = scmp.ge.s32.totalorder %s27_s18, 2  ;;  %p199_p2 = scmp.lt.s32.totalorder %s762_s17, 3 }
   0x5   : > { %s879_s18 = smov (%p29_p1, %s27_s18), 0  ;;  %p200_p3 = pnand %p678_p0, %p199_p2 }
   0x6   : > { %p236_p4 = scmp.lt.s32.totalorder (!%p200_p3), %s754_s15, 1  ;;  %s765_s26 = smov (!%p200_p3), 124  }
   0x7   : > { %203 = sbr.rel (%p200_p3) target bundleno = 754 (0x2f2), region = 32  ;;  %s767_s30 = smov (!%p200_p3), 96  }
   0x8   : > { %s770_s5 = smov (!%p200_p3), 116   ;;  %s772_s6 = smov (!%p200_p3), 108  }
   0xc   : > { %vm318_vm0 = vcmask 1042432   ;;  %v764_v0 = vmov 1.0   ;;  %s881_s15 = smov (!%p236_p4, %s754_s15), 1  ;;  %v766_v6 = vmov 0   ;;  %vm311_vm1 = vcmask 23552  }
   0xd   : > { %682 = vmatpush.msk.msra.mxu0 %vm318_vm0, %v764_v0  ;;  %695 = vmatpush.msk.msra.mxu3 %vm318_vm0, %v764_v0  ;;  %s679_s19 = sshll.u32 %s881_s15, 2  ;;  %vm269_vm2 = vcmask 124928   ;;  %vm264_vm3 = vcmask 122880   ;;  %v768_v25 = vmov 0.0   ;;  %v769_v29 = vmov 3   ;;  %s256_s11 = scalar_lea.vmem %s875_s4, %s881_s15 }
   0xe   : > { %s243_s22 = scalar_lea.vmem %s872_s1, %s679_s19  ;;  %s239_s25 = scalar_lea.vmem %s871_s0, %s679_s19  ;;  %737 = vset.pattern.permute.xlu1 %v766_v6  ;;  %738 = vset.pattern.permute.xlu2 %v766_v6  ;;  %265 = vst.msk [vmem:[#allocation3] sm:$0x1] %vm264_vm3, %v768_v25  ;;  %vm424_vm4 = vcmask 130048   ;;  %vm261_vm6 = vcmask 7168   ;;  %v771_v52 = vmov inf   ;;  %vm553_vm9 = vcmask 59392  }
   0xf   : > { %v266_v1 = vld [vmem:[%s243_s22] sm:$0x7]  ;;  %s250_s29 = scalar_lea.vmem %s873_s2, %s679_s19  ;;  %263 = vst.msk [vmem:[#allocation2 + $0x8] sm:$0xff] %vm261_vm6, %v771_v52  ;;  %vm540_vm10 = vcmask 256000   ;;  %vm493_vm11 = vcmask 0   ;;  %s253_s22 = scalar_lea.vmem %s874_s3, %s881_s15 }
  0x10   : > { %v278_v2 = vmul.f32 %v266_v1, %v266_v1  ;;  %v827_v3 = vld [vmem:[%s239_s25] sm:$0x7]  ;;  %262 = vst.msk [vmem:[#allocation2] sm:$0xff] %vm261_vm6, %v771_v52 }
  0x11   : > { %501 = vrot.lane.b32.xlu1 %v827_v3, %s765_s26  ;;  %v267_v4 = vld [vmem:[%s250_s29] sm:$0x7]  ;;  %531 = vrot.lane.b32.xlu2 %v827_v3, %s767_s30 }
  0x12   : > { %279 = vxpose.xlu0.b32.start.end [1/1] (short) (narrow) %v278_v2, 16  ;;  %v277_v5 = vmul.f32 -2.0, %v267_v4  ;;  %v268_v13 = vmul.f32 %v267_v4, %v267_v4 }
  0x14   : > { %685 = vmatpush.msk.msra.mxu1 %vm318_vm0, %v277_v5  ;;  %v270_v14 = vsel %vm269_vm2, %v268_v13, 0.0 }
  0x15   : > { %v271_v16 = vrot.slane %v270_v14, 4  ;;  %v423_v47 = vld [vmem:[#allocation3] sm:$0x1] }
  0x16   : > { %v443_v55 = vld [vmem:[#allocation2 + $0x8] sm:$0xff] }
  0x17   : > { %v272_v17 = vadd.f32 %v271_v16, %v270_v14  ;;  %v442_v58 = vld [vmem:[#allocation2] sm:$0xff] }
  0x19   : > { %v273_v18 = vrot.slane %v272_v17, 2 }
  0x1b   : > { %v274_v20 = vadd.f32 %v273_v18, %v272_v17 }
  0x1d   : > { %v275_v21 = vrot.slane %v274_v20, 1 }
  0x1f   : > { %v276_v23 = vadd.f32 %v275_v21, %v274_v20 }
  0x22   : > { %345 = vxpose.xlu0.b32.start.end [1/1] (short) (narrow) %v266_v1, 16 }
  0x6b   : > { %v532_v22 = vpop.permute.xlu2 %531 }
  0x6c   : > { %v534_v49 = vsub.f32 %v827_v3, %v532_v22 }
  0x6e   : > { %v535_v51 = vmul.f32 %v534_v49, %v534_v49 }
  0x83   : > { %v502_v15 = vpop.permute.xlu1 %501 }
  0x84   : > { %691 = vmatpush.msk.msra.mxu2 %vm318_vm0, %v502_v15 }
  0x85   : > { %692 = vmatmul.msk.f32.vlgmr.msra.gmra.mxu2 %vm311_vm1, %v827_v3 }
  0x89   : > { %739 = vset.pattern.permute.xlu0 %v769_v29 }
  0x98   : > { %498 = vperm.xlu0 %739, %v827_v3  }
  0xb6   : > { %v295_v7 = vpop.trf.xlu0 }
  0xb7   : > { %683 = vmatmul.msk.f32.vlgmr.msra.gmra.mxu0 %vm311_vm1, %v295_v7 }
  0xbe   : > { %v296_v8 = vpop.trf.xlu0 }
  0xbf   : > { %684 = vmatmul.msk.f32.vlgmr.msra.gmra.mxu3 %vm311_vm1, %v296_v8 }
  0xc6   : > { %v361_v9 = vpop.trf.xlu0 }
  0xc7   : > { %686 = vmatmul.msk.f32.vlgmr.msra.gmra.mxu1 %vm311_vm1, %v361_v9 }
  0xce   : > { %v362_v10 = vpop.trf.xlu0 }
  0xcf   : > { %687 = vmatmul.msk.f32.gmra.mxu1 %vm311_vm1, %v362_v10 }
 0x108   : > { %v524_v0 = vpop.f32.mrf.mxu2 }
 0x10a   : > { %v499_v63 = vpop.permute.xlu0 %498 }
 0x10b   : > { %v525_v5 = vadd.f32 %v524_v0, %v499_v63 }
 0x134   : > { %v339_v11 = vpop.f32.mrf.mxu0 }
 0x135   : > { %411 = vperm.xlu1 %737, %v339_v11  }
 0x142   : > { %v342_v12 = vpop.f32.mrf.mxu3 }
 0x143   : > { %416 = vperm.xlu2 %738, %v342_v12  }
 0x144   : > { %v403_v19 = vpop.f32.mrf.mxu1 }
 0x145   : > { %v404_v32 = vadd.f32 %v403_v19, %v276_v23 }
 0x14c   : > { %v406_v24 = vpop.f32.mrf.mxu1 }
 0x14d   : > { %v407_v26 = vadd.f32 %v406_v24, %v276_v23 }
 0x19d   : > { %v417_v27 = vpop.permute.xlu2 %416 }
 0x19e   : > { %v420_v28 = vadd.f32 %v417_v27, %v407_v26 }
 0x1a0   : > { %v422_v30 = vmax.f32 %v420_v28, 0.0 }
 0x1a2   : > { %v426_v31 = vsel %vm424_vm4, %v422_v30, inf }
 0x1a3   : > { %446 = vmin.xlane.f32.xlu2 %v426_v31 }
 0x1a7   : > { %v412_v33 = vpop.permute.xlu1 %411 }
 0x1a8   : > { %v419_v34 = vadd.f32 %v412_v33, %v404_v32 }
 0x1aa   : > { %v421_v35 = vmax.f32 %v419_v34, 0.0 }
 0x1ac   : > { %v425_v36 = vsel %vm424_vm4, %v421_v35, inf }
 0x1ad   : > { %444 = vmin.xlane.f32.xlu1 %v425_v36  ;;  %v427_v37 = vmin.f32 %v425_v36, %v426_v31 }
 0x1af   : > { %v428_v38 = vrot.slane %v427_v37, 4 }
 0x1b1   : > { %v429_v39 = vmin.f32 %v427_v37, %v428_v38 }
 0x1b3   : > { %v430_v40 = vrot.slane %v429_v39, 2 }
 0x1b5   : > { %v431_v41 = vmin.f32 %v429_v39, %v430_v40 }
 0x1b7   : > { %v432_v42 = vrot.slane %v431_v41, 1 }
 0x1b9   : > { %v433_v43 = vmin.f32 %v431_v41, %v432_v42 }
 0x1bb   : > { %v435_v44 = vmul.f32 0.5, %v433_v43  ;;  %527 = vrot.lane.b32.xlu2 %v827_v3, %s770_s5  ;;  %vm434_vm5 = vcmp.lt.f32.partialorder %v433_v43, 0.5 }
 0x1bd   : > { %v436_v45 = vmul.f32 %v435_v44, %v433_v43  ;;  %v688_v46 = vadd.f32 -0.125, %v435_v44 }
 0x1bf   : > { %v438_v48 = vsel %vm434_vm5, %v436_v45, %v688_v46 }
 0x1c0   : > { %v439_v50 = vadd.f32 %v438_v48, %v423_v47 }
 0x1c2   : > { %441 = vst.msk [vmem:[#allocation3] sm:$0x1] %vm264_vm3, %v439_v50 }
 0x1c6   : > { %537 = vrot.lane.b32.xlu1 %v535_v51, %s772_s6 }
 0x1c9   : > { %v456_v53 = vld [vmem:[#allocation3] sm:$0x1] }
 0x1ca   : > { %v457_v54 = vsel %vm264_vm3, %v456_v53, 0.0 }
 0x1e4   : > { %458 = vadd.xlane.f32.xlu2 %v457_v54 }
 0x216   : > { %v447_v56 = vpop.xlane.xlu2 %446 }
 0x217   : > { %v449_v57 = vmin.f32 %v443_v55, %v447_v56 }
 0x219   : > { %452 = vst.msk [vmem:[#allocation2 + $0x8] sm:$0xff] %vm261_vm6, %v449_v57 }
 0x21e   : > { %v528_v9 = vpop.permute.xlu2 %527 }
 0x21f   : > { %v530_v13 = vsub.f32 %v525_v5, %v528_v9 }
 0x220   : > { %v445_v59 = vpop.xlane.xlu1 %444  ;;  %v468_v61 = vld [vmem:[#allocation2 + $0x8] sm:$0xff] }
 0x221   : > { %v448_v60 = vmin.f32 %v442_v58, %v445_v59  ;;  %v472_v62 = vmul.f32 0.5, %v468_v61  ;;  %vm470_vm7 = vcmp.lt.f32.partialorder %v468_v61, 0.5  ;;  %v552_v15 = vmul.f32 %v530_v13, %v530_v13 }
 0x223   : > { %451 = vst.msk [vmem:[#allocation2] sm:$0xff] %vm261_vm6, %v448_v60  ;;  %v474_v1 = vmul.f32 %v472_v62, %v468_v61  ;;  %v690_v2 = vadd.f32 -0.125, %v472_v62  ;;  %v554_v17 = vsel %vm553_vm9, %v552_v15, 0.0 }
 0x225   : > { %v478_v8 = vsel %vm470_vm7, %v474_v1, %v690_v2 }
 0x226   : > { %v480_v12 = vsel %vm261_vm6, %v478_v8, 0.0 }
 0x22a   : > { %v467_v3 = vld [vmem:[#allocation2] sm:$0xff] }
 0x22b   : > { %v471_v4 = vmul.f32 0.5, %v467_v3  ;;  %vm469_vm8 = vcmp.lt.f32.partialorder %v467_v3, 0.5 }
 0x22d   : > { %v473_v6 = vmul.f32 %v471_v4, %v467_v3  ;;  %v689_v7 = vadd.f32 -0.125, %v471_v4 }
 0x22f   : > { %v477_v10 = vsel %vm469_vm8, %v473_v6, %v689_v7 }
 0x230   : > { %v479_v11 = vsel %vm261_vm6, %v477_v10, 0.0 }
 0x231   : > { %v481_v14 = vadd.f32 %v480_v12, %v479_v11 }
 0x233   : > { %482 = vadd.xlane.f32.xlu1 %v481_v14 }
 0x238   : > { %v538_v16 = vpop.permute.xlu1 %537 }
 0x239   : > { %v541_v18 = vsel %vm540_vm10, %v538_v16, 0.0 }
 0x23a   : > { %542 = vadd.xlane.f32.xlu2 %v541_v18 }
 0x23b   : > { %555 = vadd.xlane.f32.xlu1 %v554_v17 }
 0x257   : > { %v459_v19 = vpop.xlane.xlu2 %458 }
 0x258   : > { %v460_v20 = vrot.slane %v459_v19, 4 }
 0x25a   : > { %v461_v21 = vadd.f32 %v460_v20, %v459_v19 }
 0x25c   : > { %v462_v22 = vrot.slane %v461_v21, 2 }
 0x25e   : > { %v463_v23 = vadd.f32 %v462_v22, %v461_v21 }
 0x260   : > { %v464_v24 = vrot.slane %v463_v23, 1 }
 0x262   : > { %v465_v25 = vadd.f32 %v464_v24, %v463_v23 }
 0x264   : > { %696 = vpush %v465_v25 }
 0x295   : > { %s697_s7 = spop %696 }
 0x2a6   : > { %v483_v26 = vpop.xlane.xlu1 %482 }
 0x2a7   : > { %v484_v27 = vrot.slane %v483_v26, 4 }
 0x2a9   : > { %v485_v28 = vadd.f32 %v484_v27, %v483_v26 }
 0x2ab   : > { %v486_v29 = vrot.slane %v485_v28, 2 }
 0x2ad   : > { %v543_v30 = vpop.xlane.xlu2 %542  ;;  %v487_v31 = vadd.f32 %v486_v29, %v485_v28 }
 0x2ae   : > { %v544_v32 = vrot.slane %v543_v30, 4  ;;  %v556_v33 = vpop.xlane.xlu1 %555 }
 0x2af   : > { %v557_v34 = vrot.slane %v556_v33, 4  ;;  %v488_v35 = vrot.slane %v487_v31, 1 }
 0x2b0   : > { %v545_v36 = vadd.f32 %v544_v32, %v543_v30 }
 0x2b1   : > { %v558_v37 = vadd.f32 %v557_v34, %v556_v33  ;;  %v489_v38 = vadd.f32 %v488_v35, %v487_v31 }
 0x2b2   : > { %v546_v39 = vrot.slane %v545_v36, 2 }
 0x2b3   : > { %v559_v40 = vrot.slane %v558_v37, 2  ;;  %698 = vpush %v489_v38 }
 0x2b4   : > { %v547_v41 = vadd.f32 %v546_v39, %v545_v36 }
 0x2b5   : > { %v560_v42 = vadd.f32 %v559_v40, %v558_v37 }
 0x2b6   : > { %v548_v43 = vrot.slane %v547_v41, 1 }
 0x2b7   : > { %v561_v44 = vrot.slane %v560_v42, 1 }
 0x2b8   : > { %v549_v45 = vadd.f32 %v548_v43, %v547_v41 }
 0x2b9   : > { %v562_v46 = vadd.f32 %v561_v44, %v560_v42 }
 0x2ba   : > { %700 = vpush %v549_v45 }
 0x2bb   : > { %702 = vpush %v562_v46 }
 0x2e4   : > { %s699_s8 = spop %698 }
 0x2e5   : > { %s491_s12 = sadd.f32 %s699_s8, %s697_s7 }
 0x2e7   : > { %v492_v47 = vstv %s491_s12 }
 0x2e8   : > { %494 = vst.msk [vmem:[%s256_s11] sm:$0x1] %vm493_vm11, %v492_v47 }
 0x2eb   : > { %s701_s13 = spop %700 }
 0x2ec   : > { %s551_s14 = smul.f32 0.25, %s701_s13  ;;  %s703_s19 = spop %702 }
 0x2ee   : > { %s564_s23 = sadd.f32 %s703_s19, %s551_s14 }
 0x2f0   : > { %v565_v48 = vstv %s564_s23 }
 0x2f1   : > { %566 = vst.msk [vmem:[%s253_s22] sm:$0x1] %vm493_vm11, %v565_v48 }
 0x2f2 PF: > { %s15_s17 = sadd.s32 1, %s762_s17   ;;  %s876_s15 = smov %s758_s16 }
 0x2f3   : > { %p12_p5 = scmp.ge.s32.totalorder %s15_s17, 4   ;;  %s877_s16 = smov %s879_s18 }
 0x2f5   :  { %14 = sbr.rel (!%p12_p5) target bundleno = 2 (0x2), region = 88 }

</bundles_post_ra>
